<compile_context>
chip_gen: v7x
topology: tpu7x:2x2x1
jax: 0.10.0
libtpu: 0.0.40
codegen_flags: <defaults>
</compile_context>

<pallas_src>
import jax
import jax.numpy as jnp
from jax.experimental import pallas as pl
from jax.experimental.pallas import tpu as pltpu


_LANES = 128
_SUBLANES = 8
_COLS = 1024                 # lane-dense width: 8 full vregs per row-group
_MAX_BLOCK_ROWS = 512        # (512, 1024) f32 tile = 2 MiB
_SMALL_INPUT_ELEMS = 1 << 16 # below this, a standalone pallas_call is overhead


def _double_kernel(x_ref, o_ref):
    # blocks = Identity, shortcut = Identity  ->  out = x + x
    v = x_ref[...]            # single load per tile
    o_ref[...] = v + v


def _round_up(a, b):
    return ((a + b - 1) // b) * b


def residual_block_forward(x, in_channels, out_channels, *, force_pallas=False):
    """JAX/Pallas equivalent of ResidualBlock.forward.

    Both `blocks` and `shortcut` are nn.Identity, so the result is x + x
    regardless of `should_apply_shortcut`; semantics are preserved exactly.
    """
    del in_channels, out_channels  # Identity either way; kept for API parity.

    total = x.size
    if total == 0:
        return x
    if not force_pallas and total < _SMALL_INPUT_ELEMS:
        # Tiny tensors: fixed pallas_call launch/pipeline cost exceeds the HBM
        # traffic; XLA's fused elementwise add is already at the roofline.
        return x + x

    # Flatten to a lane-dense 2D slab: (rows, 1024), rows a multiple of 8.
    flat = x.reshape(-1)
    rows = _round_up(pl.cdiv(total, _COLS), _SUBLANES)
    block_rows = min(_MAX_BLOCK_ROWS, rows)
    rows = _round_up(rows, block_rows)
    padded_total = rows * _COLS
    if padded_total != total:
        flat = jnp.pad(flat, (0, padded_total - total))
    x2d = flat.reshape(rows, _COLS)

    grid = (rows // block_rows,)

    out2d = pl.pallas_call(
        _double_kernel,
        out_shape=jax.ShapeDtypeStruct((rows, _COLS), x.dtype),
        grid=grid,
        in_specs=[pl.BlockSpec((block_rows, _COLS), lambda i: (i, 0))],
        out_specs=pl.BlockSpec((block_rows, _COLS), lambda i: (i, 0)),
        # x2d is a dead temporary after this op: reuse its HBM buffer.
        input_output_aliases={0: 0},
        compiler_params=pltpu.CompilerParams(
            # Parallel grid axis -> shards across both TensorCores on v7x;
            # neutral on v5e/v6e.
            dimension_semantics=("parallel",),
        ),
    )(x2d)

    return out2d.reshape(-1)[:total].reshape(x.shape)


if __name__ == "__main__":
    key = jax.random.PRNGKey(0)
    N, C, H, W = 2, 4, 16, 16
    x = jax.random.normal(key, (N, C, H, W), dtype=jnp.float32)

    ref = x + x

    # Exercise the Pallas kernel (test shape is below the small-input cutoff,
    # so force the kernel path).
    out = residual_block_forward(x, in_channels=C, out_channels=C,
                                 force_pallas=True)
    out = jax.block_until_ready(out)
    assert out.shape == x.shape and out.dtype == x.dtype
    assert jnp.allclose(out, ref, atol=0.0, rtol=0.0), "pallas path mismatch"

    # Also check the auto-dispatch path (falls back to XLA add at this size).
    out_auto = jax.block_until_ready(
        residual_block_forward(x, in_channels=C, out_channels=C))
    assert jnp.allclose(out_auto, ref, atol=0.0, rtol=0.0), "auto path mismatch"

    print("KERNEL_OK")
</pallas_src>

<mosaic_0001>
module attributes {stable_mosaic.version = 11 : i64} {
  func.func @_double_kernel(%arg0: i32, %arg1: memref<8x1024xf32, #tpu.memory_space<vmem>>, %arg2: memref<8x1024xf32, #tpu.memory_space<vmem>>) attributes {dimension_semantics = [#tpu.dimension_semantics<parallel>], iteration_bounds = array<i64: 1>, scalar_prefetch = 0 : i64, scratch_operands = 0 : i64, tpu.core_type = #tpu.core_type<tc>, window_params = [{transform_indices = @transform_0, window_bounds = array<i64: 8, 1024>}, {transform_indices = @transform_1, window_bounds = array<i64: 8, 1024>}]} {
    %c0 = arith.constant 0 : index
    %c0_0 = arith.constant 0 : index
    %0 = vector.load %arg1[%c0, %c0_0] : memref<8x1024xf32, #tpu.memory_space<vmem>>, vector<8x1024xf32>
    %1 = arith.addf %0, %0 : vector<8x1024xf32>
    %c0_1 = arith.constant 0 : index
    %c0_2 = arith.constant 0 : index
    %2 = vector.load %arg2[%c0_1, %c0_2] : memref<8x1024xf32, #tpu.memory_space<vmem>>, vector<8x1024xf32>
    tpu.vector_store %arg2[%c0_1, %c0_2], %1 {strides = array<i32>} : memref<8x1024xf32, #tpu.memory_space<vmem>>, vector<8x1024xf32>,
    return
  }
  func.func @transform_0(%arg0: i32) -> (i32, i32) {
    %c0_i32 = arith.constant 0 : i32
    %c0_i32_0 = arith.constant 0 : i32
    return %arg0, %c0_i32 : i32, i32
  }
  func.func @transform_1(%arg0: i32) -> (i32, i32) {
    %c0_i32 = arith.constant 0 : i32
    %c0_i32_0 = arith.constant 0 : i32
    return %arg0, %c0_i32 : i32, i32
  }
}

</mosaic_0001>

<bundles_post_ra>
// kernel: tpu_custom_call.1
= control target key start
LH: loop header
LB: loop body
LE: loop exit
PB: predicated region body
PF: predicated region fallthrough
CT: control target
= control target key end

     0   :  { %6 = vsyncpa [#allocation3], 0  ;;  %s146_s0 = inlined_call_operand.hbm [shape: f32[8,1024], index: 0, kind: input, shape index: {}, may-alias: {0,1}]   ;;  %s147_s1 = inlined_call_operand.hbm [shape: f32[8,1024], index: 1, kind: output, shape index: {}, may-alias: {0,1}]  }
   0x1   :  { %7 = vsyncpa [#allocation4], 0  ;;  %s110_s6 = smov [#allocation2]   ;;  %s62_s10 = scalar_lea.hbm %s146_s0, 1024 }
   0x2   :  { %s14_s7 = sshll.u32 %s110_s6, 4  ;;  %p63_p0 = scmp.ne.s32.totalorder %s146_s0, %s62_s10  ;;  %s15_s7 = int_to_ptr.vmem [resolvable:$true] %s14_s7 }
   0x3   :  { %p66_p1 = scmp.lt.u32.totalorder %s62_s10, %s146_s0 }
   0x5   :  { %p68_p2 = pnand %p66_p1, %p63_p0 }
   0x7   :  { %71 = shalt.err (!%p68_p2)
}
   0x8   :  { %s72_s15 = scalar_lea.vmem %s15_s7, 1024  ;;  %p77_p4 = scmp.lt.s32.totalorder %s15_s7, %s15_s7 }
   0x9   :  { %p73_p3 = scmp.ne.s32.totalorder %s15_s7, %s72_s15  ;;  %p78_p5 = scmp.lt.s32.totalorder %s72_s15, %s72_s15 }
   0xb   :  { %p79_p6 = por %p78_p5, %p77_p4 }
   0xd   :  { %p80_p7 = pnand %p79_p6, %p73_p3 }
   0xf   :  { %83 = shalt.err (!%p80_p7)
}
  0x10   :  { %17 = dma.hbm_to_vmem [thread:$0]  %s146_s0, 1024, %s15_s7, [#allocation3]  }
  0x11   :  { %106 = dma.done.wait [#allocation3], 1024  }
  0x12   :  { %107 = vsyncadd [#allocation3], 4294966272  ;;  %v21_v0 = vld [vmem:[#allocation2] sm:$0xff]  ;;  %v22_v1 = vld [vmem:[#allocation2 + $0x8] sm:$0xff]  ;;  %s111_s18 = smov [#allocation5]  }
  0x13   :  { %v23_v2 = vld [vmem:[#allocation2 + $0x10] sm:$0xff]  ;;  %s51_s19 = sshll.u32 %s111_s18, 4  ;;  %v29_v3 = vadd.f32 %v21_v0, %v21_v0  ;;  %v30_v4 = vadd.f32 %v22_v1, %v22_v1  ;;  %v24_v6 = vld [vmem:[#allocation2 + $0x18] sm:$0xff]  ;;  %v25_v7 = vld [vmem:[#allocation2 + $0x20] sm:$0xff]  ;;  %s52_s19 = int_to_ptr.vmem [resolvable:$true] %s51_s19 }
  0x14   :  { %v31_v5 = vadd.f32 %v23_v2, %v23_v2  ;;  %v26_v8 = vld [vmem:[#allocation2 + $0x28] sm:$0xff]  ;;  %v32_v9 = vadd.f32 %v24_v6, %v24_v6  ;;  %v33_v10 = vadd.f32 %v25_v7, %v25_v7  ;;  %v27_v12 = vld [vmem:[#allocation2 + $0x30] sm:$0xff]  ;;  %v28_v13 = vld [vmem:[#allocation2 + $0x38] sm:$0xff]  ;;  %s84_s0 = scalar_lea.vmem %s52_s19, 1024  ;;  %p89_p9 = scmp.lt.s32.totalorder %s52_s19, %s52_s19 }
  0x15   :  { %v34_v11 = vadd.f32 %v26_v8, %v26_v8  ;;  %37 = vst [vmem:[#allocation5] sm:$0xff] %v29_v3  ;;  %38 = vst [vmem:[#allocation5 + $0x8] sm:$0xff] %v30_v4  ;;  %v35_v14 = vadd.f32 %v27_v12, %v27_v12  ;;  %v36_v15 = vadd.f32 %v28_v13, %v28_v13  ;;  %p85_p8 = scmp.ne.s32.totalorder %s52_s19, %s84_s0  ;;  %p90_p10 = scmp.lt.s32.totalorder %s84_s0, %s84_s0 }
  0x16   :  { %39 = vst [vmem:[#allocation5 + $0x10] sm:$0xff] %v31_v5  ;;  %40 = vst [vmem:[#allocation5 + $0x18] sm:$0xff] %v32_v9 }
  0x17   :  { %41 = vst [vmem:[#allocation5 + $0x20] sm:$0xff] %v33_v10  ;;  %42 = vst [vmem:[#allocation5 + $0x28] sm:$0xff] %v34_v11  ;;  %p91_p11 = por %p90_p10, %p89_p9 }
  0x18   :  { %43 = vst [vmem:[#allocation5 + $0x30] sm:$0xff] %v35_v14  ;;  %44 = vst [vmem:[#allocation5 + $0x38] sm:$0xff] %v36_v15 }
  0x19   :  { %p92_p12 = pnand %p91_p11, %p85_p8 }
  0x1b   :  { %95 = shalt.err (!%p92_p12)
}
  0x1c   :  { %s96_s22 = scalar_lea.hbm %s147_s1, 1024 }
  0x1d   :  { %p97_p13 = scmp.ne.s32.totalorder %s147_s1, %s96_s22  ;;  %p100_p0 = scmp.lt.u32.totalorder %s96_s22, %s147_s1 }
  0x1f   :  { %p102_p1 = pnand %p100_p0, %p97_p13 }
  0x21   :  { %105 = shalt.err (!%p102_p1)
}
  0x22   :  { %54 = dma.vmem_to_hbm [thread:$0]  %s52_s19, 1024, %s147_s1, [#allocation4]  }
  0x23   :  { %108 = dma.done.wait [#allocation4], 1024  }
  0x24   :  { %109 = vsyncadd [#allocation4], 4294966272 }
  0x25   :  { %58 = vsyncpa [#allocation3], 1 }
  0x26   :  { %59 = vsyncpa [#allocation4], 1 }

</bundles_post_ra>
